<compile_context>
chip_gen: v7x
topology: tpu7x:2x2x1
jax: 0.10.0
libtpu: 0.0.40
codegen_flags: <defaults>
</compile_context>

<pallas_src>
import jax
import jax.numpy as jnp
from jax.experimental import pallas as pl
from jax.experimental.pallas import tpu as pltpu

NUM_CLASSES = 10
CPAD = 128          # lane-dense padded class width (per branch)
NEG_LARGE = -1e30   # baked into padded small-branch bias lanes; safe only in f32 softmax


def _round_up(x, m):
    return (x + m - 1) // m * m


def correlative_net_kernel(x_ref, w1_ref, b1_ref, w2_ref, b2_ref, out_ref):
    # x_ref:  (TB, 3072)        f32  (cast to bf16 here -> no standalone XLA convert)
    # w1_ref: (3072, HPAD)      bf16     b1_ref: (1, HPAD)     f32
    # w2_ref: (HPAD, 2*CPAD)    bf16     b2_ref: (1, 2*CPAD)   f32 (mask baked into lanes 10..127)
    # out_ref:(TB, CPAD)        f32
    x = x_ref[...].astype(jnp.bfloat16)

    # Fused first layer (both branches share one MXU pass over x), f32 accumulation.
    h = jnp.dot(x, w1_ref[...], preferred_element_type=jnp.float32) + b1_ref[...]
    h = jnp.maximum(h, 0.0)

    # Fused second layer: block-diagonal weights produce both branches in one matmul.
    y = jnp.dot(h.astype(w2_ref.dtype), w2_ref[...],
                preferred_element_type=jnp.float32) + b2_ref[...]
    x1 = y[:, :CPAD]        # small branch; real logits lanes 0..9, NEG_LARGE elsewhere (baked bias)
    x2 = y[:, CPAD:]        # large branch; real logits lanes 0..9, exact zeros elsewhere

    # correlative_addition: base + additive * (relu(base*additive) > 0)
    # relu(v) > 0  ==  v > 0.  On padded lanes: x1*x2 = -1e30 * 0 = -0 -> mask false -> s = -1e30.
    s = x1 + jnp.where(x1 * x2 > 0.0, x2, 0.0)

    # Numerically stable log_softmax over dim 1 (f32; padded lanes contribute exp -> 0).
    m = jnp.max(s, axis=1, keepdims=True)
    z = s - m
    lse = jnp.log(jnp.sum(jnp.exp(z), axis=1, keepdims=True))
    out_ref[...] = z - lse


def init_params(key, small_size, large_size):
    """Deterministic PyTorch-Linear-style init (uniform +-1/sqrt(fan_in)).
    Weights are stored transposed: (in_features, out_features)."""
    def linear(k, fan_in, fan_out):
        kw, kb = jax.random.split(k)
        bound = 1.0 / jnp.sqrt(jnp.float32(fan_in))
        w = jax.random.uniform(kw, (fan_in, fan_out), jnp.float32, -bound, bound)
        b = jax.random.uniform(kb, (1, fan_out), jnp.float32, -bound, bound)
        return w, b

    k1, k2, k3, k4 = jax.random.split(key, 4)
    ws1, bs1 = linear(k1, 3072, small_size)
    ws2, bs2 = linear(k2, small_size, 10)
    wl1, bl1 = linear(k3, 3072, large_size)
    wl2, bl2 = linear(k4, large_size, 10)
    return dict(ws1=ws1, bs1=bs1, ws2=ws2, bs2=bs2,
                wl1=wl1, bl1=bl1, wl2=wl2, bl2=bl2)


def pack_params(p, small_size, large_size):
    """Fuse + lane-pad the four Linear layers into two matmul-friendly matrices (one-time cost).

    w1: (3072, HPAD) = [ws1 | wl1 | zeros]                                    (bf16)
    w2: (HPAD, 2*CPAD) block-diagonal:                                        (bf16)
        rows [:small]            cols [0:10]             = ws2
        rows [small:small+large] cols [CPAD:CPAD+10]     = wl2
    b2: f32; small-branch pad lanes 10..127 = NEG_LARGE (baked class mask);
        large-branch pad lanes MUST stay 0 so x1*x2 never becomes inf on pad lanes.
    """
    H = small_size + large_size
    hpad = _round_up(max(H, 128), 128)   # 128-granular; consider 256 on v6e/v7x only if MXU-bound

    w1 = jnp.zeros((3072, hpad), jnp.float32)
    w1 = w1.at[:, :small_size].set(p["ws1"])
    w1 = w1.at[:, small_size:H].set(p["wl1"])
    b1 = jnp.zeros((1, hpad), jnp.float32)
    b1 = b1.at[:, :small_size].set(p["bs1"])
    b1 = b1.at[:, small_size:H].set(p["bl1"])

    w2 = jnp.zeros((hpad, 2 * CPAD), jnp.float32)
    w2 = w2.at[:small_size, :NUM_CLASSES].set(p["ws2"])
    w2 = w2.at[small_size:H, CPAD:CPAD + NUM_CLASSES].set(p["wl2"])

    b2 = jnp.zeros((1, 2 * CPAD), jnp.float32)
    b2 = b2.at[:, :NUM_CLASSES].set(p["bs2"])
    b2 = b2.at[:, NUM_CLASSES:CPAD].set(NEG_LARGE)          # baked class-lane mask (small block)
    b2 = b2.at[:, CPAD:CPAD + NUM_CLASSES].set(p["bl2"])    # large block pad stays exactly 0

    return dict(w1=w1.astype(jnp.bfloat16), b1=b1,
                w2=w2.astype(jnp.bfloat16), b2=b2)


def _choose_batch_tile(B):
    """Batch tile: >= 2 grid steps for v7x's two TCs when possible, capped so the f32 x-tile
    double-buffer stays well inside v7x's 64 MiB VMEM.  Tiny batches use one full-array block
    (full-extent block dims bypass the 8-sublane divisibility rule, so no padding is needed)."""
    if B < 16:
        return B
    return min(512, _round_up(pl.cdiv(B, 2), 8))


def correlative_net_forward(x_nchw, packed):
    """x_nchw: (B, 3, 32, 32) f32. Returns (B, 10) log-probabilities (f32)."""
    B = x_nchw.shape[0]
    x = x_nchw.reshape(B, 3072)          # stays f32; bf16 cast happens inside the kernel

    w1, b1, w2, b2 = packed["w1"], packed["b1"], packed["w2"], packed["b2"]
    hpad = w1.shape[1]

    TB = _choose_batch_tile(B)
    grid = (pl.cdiv(B, TB),)             # no jnp.pad; ragged last block handled by Pallas

    out_pad = pl.pallas_call(
        correlative_net_kernel,
        out_shape=jax.ShapeDtypeStruct((B, CPAD), jnp.float32),
        grid_spec=pltpu.PrefetchScalarGridSpec(
            num_scalar_prefetch=0,
            grid=grid,
            in_specs=[
                pl.BlockSpec((TB, 3072), lambda i: (i, 0)),        # x: tiled over batch (f32)
                pl.BlockSpec((3072, hpad), lambda i: (0, 0)),      # weights: VMEM-resident
                pl.BlockSpec((1, hpad), lambda i: (0, 0)),
                pl.BlockSpec((hpad, 2 * CPAD), lambda i: (0, 0)),
                pl.BlockSpec((1, 2 * CPAD), lambda i: (0, 0)),
            ],
            out_specs=pl.BlockSpec((TB, CPAD), lambda i: (i, 0)),  # lane-dense output block
        ),
        compiler_params=pltpu.CompilerParams(
            dimension_semantics=("parallel",),        # batch tiles shard across v7x's 2 TCs
            vmem_limit_bytes=32 * 1024 * 1024,        # ~14 MiB used @ TB=512; <=48 MiB v7x ceiling
        ),
    )(x, w1, b1, w2, b2)

    return out_pad[:, :NUM_CLASSES]


def reference_forward(x_nchw, packed):
    """Pure-JAX reference applying the SAME bf16 quantization/casts and f32 accumulation as the
    kernel (with f32 weights this is exactly the original PyTorch forward)."""
    B = x_nchw.shape[0]
    x = x_nchw.reshape(B, 3072).astype(jnp.bfloat16)
    h = jnp.dot(x, packed["w1"], preferred_element_type=jnp.float32) + packed["b1"]
    h = jnp.maximum(h, 0.0).astype(jnp.bfloat16)
    y = jnp.dot(h, packed["w2"], preferred_element_type=jnp.float32) + packed["b2"]
    x1 = y[:, :NUM_CLASSES]
    x2 = y[:, CPAD:CPAD + NUM_CLASSES]
    s = x1 + jnp.where(x1 * x2 > 0.0, x2, 0.0)
    return jax.nn.log_softmax(s, axis=1)


if __name__ == "__main__":
    key = jax.random.PRNGKey(0)
    kx, kp = jax.random.split(key)

    B, small_size, large_size = 2, 32, 64
    x = jax.random.normal(kx, (B, 3, 32, 32), jnp.float32)   # CIFAR-10 NCHW
    params = init_params(kp, small_size, large_size)
    packed = pack_params(params, small_size, large_size)     # one-time, outside per-call path

    out = correlative_net_forward(x, packed)
    out = jax.block_until_ready(out)

    ref = reference_forward(x, packed)
    assert out.shape == (B, NUM_CLASSES)
    assert bool(jnp.all(jnp.isfinite(out)))                   # only in-bounds rows are checked
    # Note: the correlative mask (x1*x2 > 0) is discontinuous; for near-zero products bf16
    # accumulation-order differences could in principle flip it, but at this seed/shape the
    # tight check holds.
    assert jnp.allclose(out, ref, atol=5e-3, rtol=5e-3), "mismatch vs reference"

    print("KERNEL_OK")
</pallas_src>

<mosaic_0001>
module attributes {stable_mosaic.version = 11 : i64} {
  func.func @correlative_net_kernel(%arg0: i32, %arg1: memref<2x3072xf32, #tpu.memory_space<vmem>>, %arg2: memref<3072x128xbf16, #tpu.memory_space<vmem>>, %arg3: memref<1x128xf32, #tpu.memory_space<vmem>>, %arg4: memref<128x256xbf16, #tpu.memory_space<vmem>>, %arg5: memref<1x256xf32, #tpu.memory_space<vmem>>, %arg6: memref<2x128xf32, #tpu.memory_space<vmem>>) attributes {dimension_semantics = [#tpu.dimension_semantics<parallel>], iteration_bounds = array<i64: 1>, scalar_prefetch = 0 : i64, scratch_operands = 0 : i64, tpu.core_type = #tpu.core_type<tc>, window_params = [{transform_indices = @transform_0, window_bounds = array<i64: 2, 3072>}, {pipeline_mode = #tpu.pipeline_mode<synchronous>, transform_indices = @transform_1, window_bounds = array<i64: 3072, 128>}, {pipeline_mode = #tpu.pipeline_mode<synchronous>, transform_indices = @transform_2, window_bounds = array<i64: 1, 128>}, {pipeline_mode = #tpu.pipeline_mode<synchronous>, transform_indices = @transform_3, window_bounds = array<i64: 128, 256>}, {pipeline_mode = #tpu.pipeline_mode<synchronous>, transform_indices = @transform_4, window_bounds = array<i64: 1, 256>}, {transform_indices = @transform_5, window_bounds = array<i64: 2, 128>}]} {
    %c0 = arith.constant 0 : index
    %c0_0 = arith.constant 0 : index
    %0 = vector.load %arg1[%c0, %c0_0] : memref<2x3072xf32, #tpu.memory_space<vmem>>, vector<2x3072xf32>
    %1 = arith.truncf %0 : vector<2x3072xf32> to vector<2x3072xbf16>
    %c0_1 = arith.constant 0 : index
    %c0_2 = arith.constant 0 : index
    %2 = vector.load %arg2[%c0_1, %c0_2] : memref<3072x128xbf16, #tpu.memory_space<vmem>>, vector<3072x128xbf16>
    %cst = arith.constant dense<0.000000e+00> : vector<2x128xf32>
    %3 = tpu.matmul %1, %2, %cst {dimension_numbers = #tpu.dot_dimension_numbers<[1], [0], [0], [1], [0, 0, 1, 1], [], []>} : vector<2x3072xbf16>, vector<3072x128xbf16>, vector<2x128xf32> -> vector<2x128xf32>
    %c0_3 = arith.constant 0 : index
    %c0_4 = arith.constant 0 : index
    %4 = vector.load %arg3[%c0_3, %c0_4] : memref<1x128xf32, #tpu.memory_space<vmem>>, vector<1x128xf32>
    %5 = vector.broadcast %4 : vector<1x128xf32> to vector<2x128xf32>
    %6 = arith.addf %3, %5 : vector<2x128xf32>
    %cst_5 = arith.constant 0.000000e+00 : f32
    %7 = vector.broadcast %cst_5 : f32 to vector<2x128xf32>
    %8 = arith.maximumf %6, %7 : vector<2x128xf32>
    %9 = arith.truncf %8 : vector<2x128xf32> to vector<2x128xbf16>
    %c0_6 = arith.constant 0 : index
    %c0_7 = arith.constant 0 : index
    %10 = vector.load %arg4[%c0_6, %c0_7] : memref<128x256xbf16, #tpu.memory_space<vmem>>, vector<128x256xbf16>
    %cst_8 = arith.constant dense<0.000000e+00> : vector<2x256xf32>
    %11 = tpu.matmul %9, %10, %cst_8 {dimension_numbers = #tpu.dot_dimension_numbers<[1], [0], [0], [1], [0, 0, 1, 1], [], []>} : vector<2x128xbf16>, vector<128x256xbf16>, vector<2x256xf32> -> vector<2x256xf32>
    %c0_9 = arith.constant 0 : index
    %c0_10 = arith.constant 0 : index
    %12 = vector.load %arg5[%c0_9, %c0_10] : memref<1x256xf32, #tpu.memory_space<vmem>>, vector<1x256xf32>
    %13 = vector.broadcast %12 : vector<1x256xf32> to vector<2x256xf32>
    %14 = arith.addf %11, %13 : vector<2x256xf32>
    %15 = vector.extract_strided_slice %14 {offsets = [0, 0], sizes = [2, 128], strides = [1, 1]} : vector<2x256xf32> to vector<2x128xf32>
    %16 = vector.extract_strided_slice %14 {offsets = [0, 128], sizes = [2, 128], strides = [1, 1]} : vector<2x256xf32> to vector<2x128xf32>
    %17 = arith.mulf %15, %16 : vector<2x128xf32>
    %cst_11 = arith.constant 0.000000e+00 : f32
    %18 = vector.broadcast %cst_11 : f32 to vector<2x128xf32>
    %19 = arith.cmpf ogt, %17, %18 : vector<2x128xf32>
    %cst_12 = arith.constant 0.000000e+00 : f32
    %20 = vector.broadcast %cst_12 : f32 to vector<2x128xf32>
    %21 = arith.select %19, %16, %20 : vector<2x128xi1>, vector<2x128xf32>
    %22 = arith.addf %15, %21 : vector<2x128xf32>
    %cst_13 = arith.constant dense<0xFF800000> : vector<2xf32>
    %23 = vector.multi_reduction <maximumf>, %22, %cst_13 [1] : vector<2x128xf32> to vector<2xf32>
    %24 = vector.shape_cast %23 : vector<2xf32> to vector<2x1xf32>
    %25 = vector.broadcast %24 : vector<2x1xf32> to vector<2x128xf32>
    %26 = arith.subf %22, %25 : vector<2x128xf32>
    %27 = math.exp %26 : vector<2x128xf32>
    %cst_14 = arith.constant dense<0.000000e+00> : vector<2xf32>
    %28 = vector.multi_reduction <add>, %27, %cst_14 [1] : vector<2x128xf32> to vector<2xf32>
    %29 = vector.shape_cast %28 : vector<2xf32> to vector<2x1xf32>
    %30 = math.log %29 : vector<2x1xf32>
    %31 = vector.broadcast %30 : vector<2x1xf32> to vector<2x128xf32>
    %32 = arith.subf %26, %31 : vector<2x128xf32>
    %c0_15 = arith.constant 0 : index
    %c0_16 = arith.constant 0 : index
    %33 = vector.load %arg6[%c0_15, %c0_16] : memref<2x128xf32, #tpu.memory_space<vmem>>, vector<2x128xf32>
    tpu.vector_store %arg6[%c0_15, %c0_16], %32 {strides = array<i32>} : memref<2x128xf32, #tpu.memory_space<vmem>>, vector<2x128xf32>,
    return
  }
  func.func @transform_0(%arg0: i32) -> (i32, i32) {
    %c0_i32 = arith.constant 0 : i32
    %c0_i32_0 = arith.constant 0 : i32
    return %arg0, %c0_i32 : i32, i32
  }
  func.func @transform_1(%arg0: i32) -> (i32, i32) {
    %c0_i32 = arith.constant 0 : i32
    %c0_i32_0 = arith.constant 0 : i32
    %c0_i32_1 = arith.constant 0 : i32
    return %c0_i32, %c0_i32_0 : i32, i32
  }
  func.func @transform_2(%arg0: i32) -> (i32, i32) {
    %c0_i32 = arith.constant 0 : i32
    %c0_i32_0 = arith.constant 0 : i32
    %c0_i32_1 = arith.constant 0 : i32
    return %c0_i32, %c0_i32_0 : i32, i32
  }
  func.func @transform_3(%arg0: i32) -> (i32, i32) {
    %c0_i32 = arith.constant 0 : i32
    %c0_i32_0 = arith.constant 0 : i32
    %c0_i32_1 = arith.constant 0 : i32
    return %c0_i32, %c0_i32_0 : i32, i32
  }
  func.func @transform_4(%arg0: i32) -> (i32, i32) {
    %c0_i32 = arith.constant 0 : i32
    %c0_i32_0 = arith.constant 0 : i32
    %c0_i32_1 = arith.constant 0 : i32
    return %c0_i32, %c0_i32_0 : i32, i32
  }
  func.func @transform_5(%arg0: i32) -> (i32, i32) {
    %c0_i32 = arith.constant 0 : i32
    %c0_i32_0 = arith.constant 0 : i32
    return %arg0, %c0_i32 : i32, i32
  }
}

</mosaic_0001>

<bundles_post_ra>
// kernel: tpu_custom_call.1
= control target key start
LH: loop header
LB: loop body
LE: loop exit
PB: predicated region body
PF: predicated region fallthrough
CT: control target
= control target key end

     0   :  { %10 = vsyncpa [#allocation3], 0  ;;  %s3347_s0 = inlined_call_operand.hbm [shape: f32[2,3072], index: 0, kind: input, shape index: {}]   ;;  %s3348_s1 = inlined_call_operand.hbm [shape: bf16[3072,128], index: 1, kind: input, shape index: {}]   ;;  %s3349_s2 = inlined_call_operand.vmem [shape: f32[1,128], index: 2, kind: input, shape index: {}]   ;;  %s3350_s3 = inlined_call_operand.hbm [shape: bf16[128,256], index: 3, kind: input, shape index: {}]   ;;  %s3351_s4 = inlined_call_operand.vmem [shape: f32[1,256], index: 4, kind: input, shape index: {}]   ;;  %s3352_s5 = inlined_call_operand.hbm [shape: f32[2,128], index: 5, kind: output, shape index: {}]  }
   0x1   :  { %11 = vsyncpa [#allocation6], 0 }
   0x2   :  { %12 = vsyncpa [#allocation4], 0  ;;  %s3234_s18 = smov [#allocation5]   ;;  %s3140_s22 = scalar_lea.hbm %s3348_s1, 24576 }
   0x3   :  { %s28_s19 = sshll.u32 %s3234_s18, 4  ;;  %p3141_p0 = scmp.ne.s32.totalorder %s3348_s1, %s3140_s22  ;;  %s29_s19 = int_to_ptr.vmem [resolvable:$true] %s28_s19 }
   0x4   :  { %p3144_p1 = scmp.lt.u32.totalorder %s3140_s22, %s3348_s1 }
   0x6   :  { %p3146_p2 = pnand %p3144_p1, %p3141_p0 }
   0x8   :  { %3149 = shalt.err (!%p3146_p2)
}
   0x9   :  { %s3150_s27 = scalar_lea.vmem %s29_s19, 24576  ;;  %p3155_p4 = scmp.lt.s32.totalorder %s29_s19, %s29_s19 }
   0xa   :  { %p3151_p3 = scmp.ne.s32.totalorder %s29_s19, %s3150_s27  ;;  %p3156_p5 = scmp.lt.s32.totalorder %s3150_s27, %s3150_s27 }
   0xc   :  { %p3157_p6 = por %p3156_p5, %p3155_p4 }
   0xe   :  { %p3158_p7 = pnand %p3157_p6, %p3151_p3 }
  0x10   :  { %3161 = shalt.err (!%p3158_p7)
}
  0x11   :  { %s3235_s28 = smov 64   ;;  %s3236_s29 = smov 4  }
  0x12   :  { %34 = dma.hbm_to_vmem [thread:$0]  %s3348_s1, 24576, %s29_s19, [#allocation6], %s3235_s28, %s3235_s28, %s3236_s29  }
  0x13   :  { %s3237_s7 = smov [#allocation2]   ;;  %s3238_s9 = smov [#allocation7]  }
  0x14   :  { %s19_s8 = sshll.u32 %s3237_s7, 4  ;;  %s42_s10 = sshll.u32 %s3238_s9, 4  ;;  %s20_s8 = int_to_ptr.vmem [resolvable:$true] %s19_s8  ;;  %s43_s10 = int_to_ptr.vmem [resolvable:$true] %s42_s10 }
  0x15   :  { %s3162_s13 = scalar_lea.hbm %s3347_s0, 768 }
  0x16   :  { %p3163_p8 = scmp.ne.s32.totalorder %s3347_s0, %s3162_s13  ;;  %p3166_p9 = scmp.lt.u32.totalorder %s3162_s13, %s3347_s0 }
  0x18   :  { %p3168_p10 = pnand %p3166_p9, %p3163_p8 }
  0x1a   :  { %3171 = shalt.err (!%p3168_p10)
}
  0x1b   :  { %s3172_s1 = scalar_lea.vmem %s20_s8, 768  ;;  %p3177_p12 = scmp.lt.s32.totalorder %s20_s8, %s20_s8 }
  0x1c   :  { %p3173_p11 = scmp.ne.s32.totalorder %s20_s8, %s3172_s1  ;;  %p3178_p13 = scmp.lt.s32.totalorder %s3172_s1, %s3172_s1 }
  0x1e   :  { %p3179_p0 = por %p3178_p13, %p3177_p12 }
  0x20   :  { %p3180_p1 = pnand %p3179_p0, %p3173_p11 }
  0x22   :  { %3183 = shalt.err (!%p3180_p1)
}
  0x23   :  { %22 = dma.hbm_to_vmem [thread:$0]  %s3347_s0, 768, %s20_s8, [#allocation3]  }
  0x24   :  { %s3184_s22 = scalar_lea.hbm %s3350_s3, 2048 }
  0x25   :  { %p3185_p2 = scmp.ne.s32.totalorder %s3350_s3, %s3184_s22  ;;  %p3188_p3 = scmp.lt.u32.totalorder %s3184_s22, %s3350_s3 }
  0x27   :  { %p3190_p4 = pnand %p3188_p3, %p3185_p2 }
  0x29   :  { %3193 = shalt.err (!%p3190_p4)
}
  0x2a   :  { %s3194_s27 = scalar_lea.vmem %s43_s10, 2048  ;;  %p3199_p6 = scmp.lt.s32.totalorder %s43_s10, %s43_s10 }
  0x2b   :  { %p3195_p5 = scmp.ne.s32.totalorder %s43_s10, %s3194_s27  ;;  %p3200_p7 = scmp.lt.s32.totalorder %s3194_s27, %s3194_s27 }
  0x2d   :  { %p3201_p8 = por %p3200_p7, %p3199_p6 }
  0x2f   :  { %p3202_p9 = pnand %p3201_p8, %p3195_p5 }
  0x31   :  { %3205 = shalt.err (!%p3202_p9)
}
  0x32   :  { %s3239_s0 = smov 128   ;;  %s3240_s28 = smov 8  }
  0x33   :  { %48 = dma.hbm_to_vmem [thread:$0]  %s3350_s3, 2048, %s43_s10, [#allocation6], %s3239_s0, %s3239_s0, %s3240_s28  }
  0x34   :  { %3228 = dma.done.wait [#allocation3], 768  }
  0x35   :  { %3229 = vsyncadd [#allocation3], 4294966528 }
  0x36   :  { %3230 = dma.done.wait [#allocation6], 26624  }
  0x37   :  { %3231 = vsyncadd [#allocation6], 4294940672  ;;  %v2914_v0 = vld [vmem:[#allocation5 + $0x40] sm:$0xff]   ;;  %v2918_v4 = vld [vmem:[#allocation5 + $0x48] sm:$0xff]   ;;  %v3241_v22 = vmov 1983009808   ;;  %v77_v24 = vlaneseq }
  0x38   :  { %v2915_v1 = vld [vmem:[#allocation5 + $0xc0] sm:$0xff]   ;;  %2640 = vmatprep.subr.bf16.mxu0 %v2914_v0  ;;  %v2919_v5 = vld [vmem:[#allocation5 + $0xc8] sm:$0xff]   ;;  %v2922_v8 = vld [vmem:[#allocation5 + $0x50] sm:$0xff]   ;;  %v75_v23 = vunpack.c.l.s4 %v3241_v22  ;;  %vm2401_vm1 = vcmask 1041408  }
  0x39   :  { %v2916_v2 = vld [vmem:[#allocation5] sm:$0xff]   ;;  %2662 = vmatprep.subr.bf16.mxu1 %v2915_v1  ;;  %v2920_v6 = vld [vmem:[#allocation5 + $0x8] sm:$0xff]   ;;  %v2923_v9 = vld [vmem:[#allocation5 + $0xd0] sm:$0xff]   ;;  %v3310_v30 = vshrl.u32 %v77_v24, 7 }
  0x3a   :  { %v2917_v3 = vld [vmem:[#allocation5 + $0x80] sm:$0xff]   ;;  %2641 = vmatpush3.bf16.msra.mxu0 %v2916_v2  ;;  %v2921_v7 = vld [vmem:[#allocation5 + $0x88] sm:$0xff]   ;;  %v2924_v10 = vld [vmem:[#allocation5 + $0x10] sm:$0xff]   ;;  %v76_v29 = vunpack.c.0.s8 %v75_v23 }
  0x3b   :  { %2663 = vmatpush3.bf16.msra.mxu1 %v2917_v3  ;;  %2642 = vmatprep.subr.bf16.mxu0 %v2918_v4  ;;  %v2925_v11 = vld [vmem:[#allocation5 + $0x90] sm:$0xff]   ;;  %v2926_v12 = vld [vmem:[#allocation5 + $0x58] sm:$0xff]   ;;  %v2930_v16 = vld [vmem:[#allocation5 + $0x60] sm:$0xff]  }
  0x3c   :  { %2664 = vmatprep.subr.bf16.mxu1 %v2919_v5  ;;  %v2927_v13 = vld [vmem:[#allocation5 + $0xd8] sm:$0xff]   ;;  %v2931_v17 = vld [vmem:[#allocation5 + $0xe0] sm:$0xff]   ;;  %v2934_v20 = vld [vmem:[#allocation5 + $0x68] sm:$0xff]   ;;  %v3313_v35 = vsub.s32 %v76_v29, %v3310_v30 }
  0x3d   :  { %v2928_v14 = vld [vmem:[#allocation5 + $0x18] sm:$0xff]   ;;  %v2932_v18 = vld [vmem:[#allocation5 + $0x20] sm:$0xff]   ;;  %v2935_v21 = vld [vmem:[#allocation5 + $0xe8] sm:$0xff]  }
  0x3e   :  { %2643 = vmatpush3.bf16.msra.mxu0 %v2920_v6  ;;  %v2929_v15 = vld [vmem:[#allocation5 + $0x98] sm:$0xff]   ;;  %v2933_v19 = vld [vmem:[#allocation5 + $0xa0] sm:$0xff]   ;;  %v2936_v25 = vld [vmem:[#allocation5 + $0x28] sm:$0xff]  }
  0x3f   :  { %2665 = vmatpush3.bf16.msra.mxu1 %v2921_v7  ;;  %2644 = vmatprep.subr.bf16.mxu0 %v2922_v8  ;;  %v2937_v26 = vld [vmem:[#allocation5 + $0xa8] sm:$0xff]   ;;  %v2938_v27 = vld [vmem:[#allocation5 + $0x70] sm:$0xff]   ;;  %v2942_v33 = vld [vmem:[#allocation5 + $0x78] sm:$0xff]  }
  0x40   :  { %2666 = vmatprep.subr.bf16.mxu1 %v2923_v9  ;;  %v2939_v28 = vld [vmem:[#allocation5 + $0xf0] sm:$0xff]   ;;  %v2943_v34 = vld [vmem:[#allocation5 + $0xf8] sm:$0xff]   ;;  %v2947_v41 = vld [vmem:[#allocation5 + $0x140] sm:$0xff]  }
  0x41   :  { %v2940_v31 = vld [vmem:[#allocation5 + $0x30] sm:$0xff]   ;;  %v2944_v36 = vld [vmem:[#allocation5 + $0x38] sm:$0xff]   ;;  %v2948_v42 = vld [vmem:[#allocation5 + $0x1c0] sm:$0xff]  }
  0x42   :  { %2645 = vmatpush3.bf16.msra.mxu0 %v2924_v10  ;;  %v2941_v32 = vld [vmem:[#allocation5 + $0xb0] sm:$0xff]   ;;  %v2945_v37 = vld [vmem:[#allocation5 + $0xb8] sm:$0xff]   ;;  %v2949_v46 = vld [vmem:[#allocation5 + $0x100] sm:$0xff]  }
  0x43   :  { %2667 = vmatpush3.bf16.msra.mxu1 %v2925_v11  ;;  %2646 = vmatprep.subr.bf16.mxu0 %v2926_v12  ;;  %v61_v38 = vld [vmem:[#allocation2] sm:$0xff]  ;;  %v2950_v49 = vld [vmem:[#allocation5 + $0x180] sm:$0xff]   ;;  %v2951_v51 = vld [vmem:[#allocation5 + $0x148] sm:$0xff]  }
  0x44   :  { %2668 = vmatprep.subr.bf16.mxu1 %v2927_v13  ;;  %v80_v39 = vrot.slane %v61_v38, %v3313_v35  ;;  %v73_v40 = vcombine.high %v61_v38, %v61_v38  ;;  %v2952_v53 = vld [vmem:[#allocation5 + $0x1c8] sm:$0xff]   ;;  %v2955_v56 = vld [vmem:[#allocation5 + $0x150] sm:$0xff]   ;;  %v2959_v60 = vld [vmem:[#allocation5 + $0x158] sm:$0xff]  }
  0x45   :  { %v2953_v54 = vld [vmem:[#allocation5 + $0x108] sm:$0xff]   ;;  %v2956_v57 = vld [vmem:[#allocation5 + $0x1d0] sm:$0xff]   ;;  %v2960_v61 = vld [vmem:[#allocation5 + $0x1d8] sm:$0xff]  }
  0x46   :  { %2647 = vmatpush3.bf16.msra.mxu0 %v2928_v14  ;;  %v88_v43 = vcombine.high %v80_v39, %v80_v39  ;;  %v87_v44 = vrot.slane %v73_v40, %v3313_v35  ;;  %v199_v45 = vpack.c.bf16 %v80_v39, %v80_v39  ;;  %v2954_v55 = vld [vmem:[#allocation5 + $0x188] sm:$0xff]   ;;  %v2957_v58 = vld [vmem:[#allocation5 + $0x110] sm:$0xff]   ;;  %v2961_v62 = vld [vmem:[#allocation5 + $0x118] sm:$0xff]  }
  0x47   :  { %2669 = vmatpush3.bf16.msra.mxu1 %v2929_v15  ;;  %2648 = vmatprep.subr.bf16.mxu0 %v2930_v16  ;;  %v2958_v59 = vld [vmem:[#allocation5 + $0x190] sm:$0xff]   ;;  %v2962_v63 = vld [vmem:[#allocation5 + $0x198] sm:$0xff]   ;;  %v2963_v0 = vld [vmem:[#allocation5 + $0x160] sm:$0xff]  }
  0x48   :  { %2670 = vmatprep.subr.bf16.mxu1 %v2931_v17  ;;  %v200_v47 = vpack.c.bf16 %v88_v43, %v88_v43  ;;  %v89_v48 = vcombine.high %v87_v44, %v87_v44  ;;  %v201_v50 = vpack.c.bf16 %v87_v44, %v87_v44  ;;  %v2964_v1 = vld [vmem:[#allocation5 + $0x1e0] sm:$0xff]   ;;  %v2967_v4 = vld [vmem:[#allocation5 + $0x168] sm:$0xff]   ;;  %v2971_v8 = vld [vmem:[#allocation5 + $0x170] sm:$0xff]  }
  0x49   :  { %v2965_v2 = vld [vmem:[#allocation5 + $0x120] sm:$0xff]   ;;  %v2968_v5 = vld [vmem:[#allocation5 + $0x1e8] sm:$0xff]   ;;  %v2972_v9 = vld [vmem:[#allocation5 + $0x1f0] sm:$0xff]  }
  0x4a   :  { %2649 = vmatpush3.bf16.msra.mxu0 %v2932_v18  ;;  %1798 = vmatprep.mubr.bf16.mxu0 %v200_v47  ;;  %v202_v52 = vpack.c.bf16 %v89_v48, %v89_v48  ;;  %v2966_v3 = vld [vmem:[#allocation5 + $0x1a0] sm:$0xff]   ;;  %v2969_v6 = vld [vmem:[#allocation5 + $0x128] sm:$0xff]   ;;  %v2973_v10 = vld [vmem:[#allocation5 + $0x130] sm:$0xff]  }
  0x4b   :  { %2671 = vmatpush3.bf16.msra.mxu1 %v2933_v19  ;;  %2650 = vmatprep.subr.bf16.mxu0 %v2934_v20  ;;  %v2970_v7 = vld [vmem:[#allocation5 + $0x1a8] sm:$0xff]   ;;  %v2974_v11 = vld [vmem:[#allocation5 + $0x1b0] sm:$0xff]   ;;  %v2975_v12 = vld [vmem:[#allocation5 + $0x178] sm:$0xff]  }
  0x4c   :  { %2672 = vmatprep.subr.bf16.mxu1 %v2935_v21  ;;  %1838 = vmatprep.mubr.bf16.mxu1 %v202_v52  ;;  %v2976_v13 = vld [vmem:[#allocation5 + $0x1f8] sm:$0xff]   ;;  %v2980_v19 = vld [vmem:[#allocation5 + $0x240] sm:$0xff]   ;;  %v2984_v29 = vld [vmem:[#allocation5 + $0x248] sm:$0xff]  }
  0x4d   :  { %v2977_v14 = vld [vmem:[#allocation5 + $0x138] sm:$0xff]   ;;  %v2981_v22 = vld [vmem:[#allocation5 + $0x2c0] sm:$0xff]   ;;  %v2990_v38 = vld [vmem:[#allocation5 + $0x210] sm:$0xff]  }
  0x4e   :  { %2651 = vmatpush3.bf16.msra.mxu0 %v2936_v25  ;;  %v62_v15 = vld [vmem:[#allocation2 + $0x8] sm:$0xff]  ;;  %v2982_v24 = vld [vmem:[#allocation5 + $0x200] sm:$0xff]   ;;  %v2991_v39 = vld [vmem:[#allocation5 + $0x290] sm:$0xff]  }
  0x4f   :  { %2673 = vmatpush3.bf16.msra.mxu1 %v2937_v26  ;;  %2652 = vmatprep.subr.bf16.mxu0 %v2938_v27  ;;  %v2978_v16 = vld [vmem:[#allocation5 + $0x1b8] sm:$0xff]   ;;  %v97_v17 = vrot.slane %v62_v15, %v3313_v35  ;;  %v90_v18 = vcombine.high %v62_v15, %v62_v15  ;;  %v2983_v27 = vld [vmem:[#allocation5 + $0x280] sm:$0xff]   ;;  %v3000_v48 = vld [vmem:[#allocation5 + $0x268] sm:$0xff]  }
  0x50   :  { %2674 = vmatprep.subr.bf16.mxu1 %v2939_v28  ;;  %v2992_v40 = vld [vmem:[#allocation5 + $0x258] sm:$0xff]   ;;  %v2996_v44 = vld [vmem:[#allocation5 + $0x260] sm:$0xff]   ;;  %v3004_v52 = vld [vmem:[#allocation5 + $0x270] sm:$0xff]  }
  0x51   :  { %v105_v20 = vcombine.high %v97_v17, %v97_v17  ;;  %v104_v21 = vrot.slane %v90_v18, %v3313_v35  ;;  %v203_v23 = vpack.c.bf16 %v97_v17, %v97_v17  ;;  %v2995_v43 = vld [vmem:[#allocation5 + $0x298] sm:$0xff]   ;;  %v2999_v47 = vld [vmem:[#allocation5 + $0x2a0] sm:$0xff]   ;;  %v3022_v15 = vld [vmem:[#allocation5 + $0x3d0] sm:$0xff]  }
  0x52   :  { %2653 = vmatpush3.bf16.msra.mxu0 %v2940_v31  ;;  %v3024_v17 = vld [vmem:[#allocation5 + $0x390] sm:$0xff]   ;;  %v3025_v18 = vld [vmem:[#allocation5 + $0x358] sm:$0xff]  }
  0x53   :  { %2675 = vmatpush3.bf16.msra.mxu1 %v2941_v32  ;;  %2654 = vmatprep.subr.bf16.mxu0 %v2942_v33  ;;  %v204_v25 = vpack.c.bf16 %v105_v20, %v105_v20  ;;  %v106_v26 = vcombine.high %v104_v21, %v104_v21  ;;  %v205_v28 = vpack.c.bf16 %v104_v21, %v104_v21  ;;  %v2985_v32 = vld [vmem:[#allocation5 + $0x2c8] sm:$0xff]   ;;  %v3027_v20 = vld [vmem:[#allocation5 + $0x318] sm:$0xff]  }
  0x54   :  { %2676 = vmatprep.subr.bf16.mxu1 %v2943_v34  ;;  %v2986_v33 = vld [vmem:[#allocation5 + $0x208] sm:$0xff]   ;;  %v3028_v21 = vld [vmem:[#allocation5 + $0x398] sm:$0xff]  }
  0x55   :  { %v206_v31 = vpack.c.bf16 %v106_v26, %v106_v26  ;;  %v2987_v34 = vld [vmem:[#allocation5 + $0x288] sm:$0xff]  }
  0x56   :  { %2655 = vmatpush3.bf16.msra.mxu0 %v2944_v36  ;;  %v2988_v36 = vld [vmem:[#allocation5 + $0x250] sm:$0xff]   ;;  %v3033_v26 = vld [vmem:[#allocation5 + $0x368] sm:$0xff]  }
  0x57   :  { %2677 = vmatpush3.bf16.msra.mxu1 %v2945_v37  ;;  %2684 = vmatprep.subr.bf16.mxu0 %v2947_v41  ;;  %v2989_v37 = vld [vmem:[#allocation5 + $0x2d0] sm:$0xff]   ;;  %v2993_v41 = vld [vmem:[#allocation5 + $0x2d8] sm:$0xff]  }
  0x58   :  { %2706 = vmatprep.subr.bf16.mxu1 %v2948_v42  ;;  %v2994_v42 = vld [vmem:[#allocation5 + $0x218] sm:$0xff]  }
  0x59   :  { %1799 = vmatmul.mubr.bf16.vlgmr.msra.gmra.mrb[0].mxu0 %v199_v45  ;;  %v2997_v45 = vld [vmem:[#allocation5 + $0x2e0] sm:$0xff]  }
  0x5a   :  { %2685 = vmatpush3.bf16.msra.mxu0 %v2949_v46  ;;  %1839 = vmatmul.mubr.bf16.vlgmr.msra.gmra.mrb[0].mxu1 %v201_v50  ;;  %v2998_v46 = vld [vmem:[#allocation5 + $0x220] sm:$0xff]   ;;  %v3002_v50 = vld [vmem:[#allocation5 + $0x228] sm:$0xff]  }
  0x5b   :  { %2686 = vmatprep.subr.bf16.mxu0 %v2951_v51  ;;  %2707 = vmatpush3.bf16.msra.mxu1 %v2950_v49  ;;  %v3001_v49 = vld [vmem:[#allocation5 + $0x2e8] sm:$0xff]  }
  0x5c   :  { %2708 = vmatprep.subr.bf16.mxu1 %v2952_v53  ;;  %1878 = vmatprep.mubr.bf16.mxu0 %v204_v25  ;;  %v3003_v51 = vld [vmem:[#allocation5 + $0x2a8] sm:$0xff]   ;;  %v3005_v53 = vld [vmem:[#allocation5 + $0x2f0] sm:$0xff]   ;;  %v3032_v25 = vld [vmem:[#allocation5 + $0x3a0] sm:$0xff]  }
  0x5d   :  { %1918 = vmatprep.mubr.bf16.mxu1 %v206_v31  ;;  %v3037_v31 = vld [vmem:[#allocation5 + $0x370] sm:$0xff]  }
  0x5e   :  { %2687 = vmatpush3.bf16.msra.mxu0 %v2953_v54  ;;  %v3006_v54 = vld [vmem:[#allocation5 + $0x230] sm:$0xff]  }
  0x5f   :  { %2688 = vmatprep.subr.bf16.mxu0 %v2955_v56  ;;  %2709 = vmatpush3.bf16.msra.mxu1 %v2954_v55  ;;  %v3007_v55 = vld [vmem:[#allocation5 + $0x2b0] sm:$0xff]   ;;  %v3008_v56 = vld [vmem:[#allocation5 + $0x278] sm:$0xff]  }
  0x60   :  { %2710 = vmatprep.subr.bf16.mxu1 %v2956_v57  ;;  %v3009_v57 = vld [vmem:[#allocation5 + $0x2f8] sm:$0xff]  }
  0x62   :  { %2689 = vmatpush3.bf16.msra.mxu0 %v2957_v58  ;;  %v3010_v58 = vld [vmem:[#allocation5 + $0x238] sm:$0xff]  }
  0x63   :  { %2690 = vmatprep.subr.bf16.mxu0 %v2959_v60  ;;  %2711 = vmatpush3.bf16.msra.mxu1 %v2958_v59  ;;  %v63_v59 = vld [vmem:[#allocation2 + $0x10] sm:$0xff]  ;;  %v3011_v60 = vld [vmem:[#allocation5 + $0x2b8] sm:$0xff]  }
  0x64   :  { %2712 = vmatprep.subr.bf16.mxu1 %v2960_v61  ;;  %v114_v61 = vrot.slane %v63_v59, %v3313_v35 }
  0x66   :  { %2691 = vmatpush3.bf16.msra.mxu0 %v2961_v62  ;;  %v107_v62 = vcombine.high %v63_v59, %v63_v59  ;;  %v3055_v59 = vld [vmem:[#allocation5 + $0x4d0] sm:$0xff]  }
  0x67   :  { %2692 = vmatprep.subr.bf16.mxu0 %v2963_v0  ;;  %2713 = vmatpush3.bf16.msra.mxu1 %v2962_v63  ;;  %v3013_v63 = vld [vmem:[#allocation5 + $0x340] sm:$0xff]   ;;  %v122_v0 = vcombine.high %v114_v61, %v114_v61 }
  0x68   :  { %2714 = vmatprep.subr.bf16.mxu1 %v2964_v1  ;;  %v121_v1 = vrot.slane %v107_v62, %v3313_v35  ;;  %v3058_v62 = vld [vmem:[#allocation5 + $0x458] sm:$0xff]  }
  0x6a   :  { %2693 = vmatpush3.bf16.msra.mxu0 %v2965_v2  ;;  %v3014_v2 = vld [vmem:[#allocation5 + $0x3c0] sm:$0xff]  }
  0x6b   :  { %2694 = vmatprep.subr.bf16.mxu0 %v2967_v4  ;;  %2715 = vmatpush3.bf16.msra.mxu1 %v2966_v3  ;;  %v207_v3 = vpack.c.bf16 %v114_v61, %v114_v61  ;;  %v3015_v4 = vld [vmem:[#allocation5 + $0x300] sm:$0xff]   ;;  %v3057_v61 = vld [vmem:[#allocation5 + $0x490] sm:$0xff]  }
  0x6c   :  { %2716 = vmatprep.subr.bf16.mxu1 %v2968_v5  ;;  %v208_v5 = vpack.c.bf16 %v122_v0, %v122_v0  ;;  %v3060_v0 = vld [vmem:[#allocation5 + $0x418] sm:$0xff]  }
  0x6e   :  { %2695 = vmatpush3.bf16.msra.mxu0 %v2969_v6  ;;  %v123_v6 = vcombine.high %v121_v1, %v121_v1 }
  0x6f   :  { %2696 = vmatprep.subr.bf16.mxu0 %v2971_v8  ;;  %2717 = vmatpush3.bf16.msra.mxu1 %v2970_v7  ;;  %v3016_v7 = vld [vmem:[#allocation5 + $0x380] sm:$0xff]   ;;  %v209_v8 = vpack.c.bf16 %v121_v1, %v121_v1  ;;  %v3061_v1 = vld [vmem:[#allocation5 + $0x498] sm:$0xff]  }
  0x70   :  { %2718 = vmatprep.subr.bf16.mxu1 %v2972_v9  ;;  %v3017_v9 = vld [vmem:[#allocation5 + $0x348] sm:$0xff]  }
  0x72   :  { %2697 = vmatpush3.bf16.msra.mxu0 %v2973_v10  ;;  %v210_v10 = vpack.c.bf16 %v123_v6, %v123_v6  ;;  %v3066_v6 = vld [vmem:[#allocation5 + $0x468] sm:$0xff]  }
  0x73   :  { %2698 = vmatprep.subr.bf16.mxu0 %v2975_v12  ;;  %2719 = vmatpush3.bf16.msra.mxu1 %v2974_v11  ;;  %v3018_v11 = vld [vmem:[#allocation5 + $0x3c8] sm:$0xff]  }
  0x74   :  { %2720 = vmatprep.subr.bf16.mxu1 %v2976_v13  ;;  %v3019_v12 = vld [vmem:[#allocation5 + $0x308] sm:$0xff]  }
  0x75   :  { %v3020_v13 = vld [vmem:[#allocation5 + $0x388] sm:$0xff]  }
  0x76   :  { %2699 = vmatpush3.bf16.msra.mxu0 %v2977_v14  ;;  %v3021_v14 = vld [vmem:[#allocation5 + $0x350] sm:$0xff]  }
  0x77   :  { %2728 = vmatprep.subr.bf16.mxu0 %v2980_v19  ;;  %2721 = vmatpush3.bf16.msra.mxu1 %v2978_v16  ;;  %v3023_v16 = vld [vmem:[#allocation5 + $0x310] sm:$0xff]   ;;  %v3026_v19 = vld [vmem:[#allocation5 + $0x3d8] sm:$0xff]  }
  0x78   :  { %2750 = vmatprep.subr.bf16.mxu1 %v2981_v22  ;;  %v3029_v22 = vld [vmem:[#allocation5 + $0x360] sm:$0xff]  }
  0x79   :  { %1879 = vmatmul.mubr.bf16.vlgmr.msra.gmra.mrb[4].mxu0 %v203_v23  ;;  %v3030_v23 = vld [vmem:[#allocation5 + $0x3e0] sm:$0xff]  }
  0x7a   :  { %2729 = vmatpush3.bf16.msra.mxu0 %v2982_v24  ;;  %1919 = vmatmul.mubr.bf16.vlgmr.msra.gmra.mrb[4].mxu1 %v205_v28  ;;  %v3031_v24 = vld [vmem:[#allocation5 + $0x320] sm:$0xff]   ;;  %v3035_v28 = vld [vmem:[#allocation5 + $0x328] sm:$0xff]  }
  0x7b   :  { %2730 = vmatprep.subr.bf16.mxu0 %v2984_v29  ;;  %2751 = vmatpush3.bf16.msra.mxu1 %v2983_v27  ;;  %v3034_v27 = vld [vmem:[#allocation5 + $0x3e8] sm:$0xff]  }
  0x7c   :  { %2752 = vmatprep.subr.bf16.mxu1 %v2985_v32  ;;  %1958 = vmatprep.mubr.bf16.mxu0 %v208_v5  ;;  %v3036_v29 = vld [vmem:[#allocation5 + $0x3a8] sm:$0xff]   ;;  %v3038_v32 = vld [vmem:[#allocation5 + $0x3f0] sm:$0xff]   ;;  %v3065_v5 = vld [vmem:[#allocation5 + $0x4a0] sm:$0xff]  }
  0x7d   :  { %1998 = vmatprep.mubr.bf16.mxu1 %v210_v10  ;;  %v3070_v10 = vld [vmem:[#allocation5 + $0x470] sm:$0xff]  }
  0x7e   :  { %2731 = vmatpush3.bf16.msra.mxu0 %v2986_v33  ;;  %v3039_v33 = vld [vmem:[#allocation5 + $0x330] sm:$0xff]  }
  0x7f   :  { %2732 = vmatprep.subr.bf16.mxu0 %v2988_v36  ;;  %2753 = vmatpush3.bf16.msra.mxu1 %v2987_v34  ;;  %v3040_v34 = vld [vmem:[#allocation5 + $0x3b0] sm:$0xff]   ;;  %v3041_v36 = vld [vmem:[#allocation5 + $0x378] sm:$0xff]  }
  0x80   :  { %2754 = vmatprep.subr.bf16.mxu1 %v2989_v37  ;;  %v3042_v37 = vld [vmem:[#allocation5 + $0x3f8] sm:$0xff]  }
  0x82   :  { %2733 = vmatpush3.bf16.msra.mxu0 %v2990_v38  ;;  %v3043_v38 = vld [vmem:[#allocation5 + $0x338] sm:$0xff]  }
  0x83   :  { %2734 = vmatprep.subr.bf16.mxu0 %v2992_v40  ;;  %2755 = vmatpush3.bf16.msra.mxu1 %v2991_v39  ;;  %v64_v39 = vld [vmem:[#allocation2 + $0x18] sm:$0xff] }
  0x84   :  { %2756 = vmatprep.subr.bf16.mxu1 %v2993_v41  ;;  %v131_v40 = vrot.slane %v64_v39, %v3313_v35  ;;  %v124_v41 = vcombine.high %v64_v39, %v64_v39  ;;  %v3088_v39 = vld [vmem:[#allocation5 + $0x5d0] sm:$0xff]  }
  0x86   :  { %2735 = vmatpush3.bf16.msra.mxu0 %v2994_v42  ;;  %v3046_v42 = vld [vmem:[#allocation5 + $0x440] sm:$0xff]  }
  0x87   :  { %2736 = vmatprep.subr.bf16.mxu0 %v2996_v44  ;;  %2757 = vmatpush3.bf16.msra.mxu1 %v2995_v43  ;;  %v3044_v43 = vld [vmem:[#allocation5 + $0x3b8] sm:$0xff]   ;;  %v139_v44 = vcombine.high %v131_v40, %v131_v40 }
  0x88   :  { %2758 = vmatprep.subr.bf16.mxu1 %v2997_v45  ;;  %v138_v45 = vrot.slane %v124_v41, %v3313_v35  ;;  %v3090_v41 = vld [vmem:[#allocation5 + $0x590] sm:$0xff]  }
  0x8a   :  { %2737 = vmatpush3.bf16.msra.mxu0 %v2998_v46  ;;  %v3047_v46 = vld [vmem:[#allocation5 + $0x4c0] sm:$0xff]  }
  0x8b   :  { %2738 = vmatprep.subr.bf16.mxu0 %v3000_v48  ;;  %2759 = vmatpush3.bf16.msra.mxu1 %v2999_v47  ;;  %v211_v47 = vpack.c.bf16 %v131_v40, %v131_v40  ;;  %v3048_v48 = vld [vmem:[#allocation5 + $0x400] sm:$0xff]   ;;  %v3089_v40 = vld [vmem:[#allocation5 + $0x510] sm:$0xff]  }
  0x8c   :  { %2760 = vmatprep.subr.bf16.mxu1 %v3001_v49  ;;  %v212_v49 = vpack.c.bf16 %v139_v44, %v139_v44  ;;  %v3093_v44 = vld [vmem:[#allocation5 + $0x518] sm:$0xff]  }
  0x8e   :  { %2739 = vmatpush3.bf16.msra.mxu0 %v3002_v50  ;;  %v140_v50 = vcombine.high %v138_v45, %v138_v45 }
  0x8f   :  { %2740 = vmatprep.subr.bf16.mxu0 %v3004_v52  ;;  %2761 = vmatpush3.bf16.msra.mxu1 %v3003_v51  ;;  %v3049_v51 = vld [vmem:[#allocation5 + $0x480] sm:$0xff]   ;;  %v213_v52 = vpack.c.bf16 %v138_v45, %v138_v45  ;;  %v3094_v45 = vld [vmem:[#allocation5 + $0x598] sm:$0xff]  }
  0x90   :  { %2762 = vmatprep.subr.bf16.mxu1 %v3005_v53  ;;  %v3050_v53 = vld [vmem:[#allocation5 + $0x448] sm:$0xff]  }
  0x92   :  { %2741 = vmatpush3.bf16.msra.mxu0 %v3006_v54  ;;  %v214_v54 = vpack.c.bf16 %v140_v50, %v140_v50  ;;  %v3099_v50 = vld [vmem:[#allocation5 + $0x568] sm:$0xff]  }
  0x93   :  { %2742 = vmatprep.subr.bf16.mxu0 %v3008_v56  ;;  %2763 = vmatpush3.bf16.msra.mxu1 %v3007_v55  ;;  %v3051_v55 = vld [vmem:[#allocation5 + $0x4c8] sm:$0xff]  }
  0x94   :  { %2764 = vmatprep.subr.bf16.mxu1 %v3009_v57  ;;  %v3052_v56 = vld [vmem:[#allocation5 + $0x408] sm:$0xff]  }
  0x95   :  { %v3053_v57 = vld [vmem:[#allocation5 + $0x488] sm:$0xff]  }
  0x96   :  { %2743 = vmatpush3.bf16.msra.mxu0 %v3010_v58  ;;  %v3054_v58 = vld [vmem:[#allocation5 + $0x450] sm:$0xff]  }
  0x97   :  { %2772 = vmatprep.subr.bf16.mxu0 %v3013_v63  ;;  %2765 = vmatpush3.bf16.msra.mxu1 %v3011_v60  ;;  %v3056_v60 = vld [vmem:[#allocation5 + $0x410] sm:$0xff]   ;;  %v3059_v63 = vld [vmem:[#allocation5 + $0x4d8] sm:$0xff]  }
  0x98   :  { %2794 = vmatprep.subr.bf16.mxu1 %v3014_v2  ;;  %v3062_v2 = vld [vmem:[#allocation5 + $0x460] sm:$0xff]  }
  0x99   :  { %1959 = vmatmul.mubr.bf16.vlgmr.msra.gmra.mrb[8].mxu0 %v207_v3  ;;  %v3063_v3 = vld [vmem:[#allocation5 + $0x4e0] sm:$0xff]  }
  0x9a   :  { %2773 = vmatpush3.bf16.msra.mxu0 %v3015_v4  ;;  %1999 = vmatmul.mubr.bf16.vlgmr.msra.gmra.mrb[8].mxu1 %v209_v8  ;;  %v3064_v4 = vld [vmem:[#allocation5 + $0x420] sm:$0xff]   ;;  %v3068_v8 = vld [vmem:[#allocation5 + $0x428] sm:$0xff]  }
  0x9b   :  { %2774 = vmatprep.subr.bf16.mxu0 %v3017_v9  ;;  %2795 = vmatpush3.bf16.msra.mxu1 %v3016_v7  ;;  %v3067_v7 = vld [vmem:[#allocation5 + $0x4e8] sm:$0xff]  }
  0x9c   :  { %2796 = vmatprep.subr.bf16.mxu1 %v3018_v11  ;;  %2038 = vmatprep.mubr.bf16.mxu0 %v212_v49  ;;  %v3069_v9 = vld [vmem:[#allocation5 + $0x4a8] sm:$0xff]   ;;  %v3071_v11 = vld [vmem:[#allocation5 + $0x4f0] sm:$0xff]   ;;  %v3098_v49 = vld [vmem:[#allocation5 + $0x5a0] sm:$0xff]  }
  0x9d   :  { %2078 = vmatprep.mubr.bf16.mxu1 %v214_v54  ;;  %v3103_v54 = vld [vmem:[#allocation5 + $0x570] sm:$0xff]  }
  0x9e   :  { %2775 = vmatpush3.bf16.msra.mxu0 %v3019_v12  ;;  %v3072_v12 = vld [vmem:[#allocation5 + $0x430] sm:$0xff]  }
  0x9f   :  { %2776 = vmatprep.subr.bf16.mxu0 %v3021_v14  ;;  %2797 = vmatpush3.bf16.msra.mxu1 %v3020_v13  ;;  %v3073_v13 = vld [vmem:[#allocation5 + $0x4b0] sm:$0xff]   ;;  %v3074_v14 = vld [vmem:[#allocation5 + $0x478] sm:$0xff]  }
  0xa0   :  { %2798 = vmatprep.subr.bf16.mxu1 %v3022_v15  ;;  %v3075_v15 = vld [vmem:[#allocation5 + $0x4f8] sm:$0xff]  }
  0xa2   :  { %2777 = vmatpush3.bf16.msra.mxu0 %v3023_v16  ;;  %v3076_v16 = vld [vmem:[#allocation5 + $0x438] sm:$0xff]  }
  0xa3   :  { %2778 = vmatprep.subr.bf16.mxu0 %v3025_v18  ;;  %2799 = vmatpush3.bf16.msra.mxu1 %v3024_v17  ;;  %v65_v17 = vld [vmem:[#allocation2 + $0x20] sm:$0xff]  ;;  %v3077_v18 = vld [vmem:[#allocation5 + $0x4b8] sm:$0xff]  }
  0xa4   :  { %2800 = vmatprep.subr.bf16.mxu1 %v3026_v19  ;;  %v148_v19 = vrot.slane %v65_v17, %v3313_v35 }
  0xa6   :  { %2779 = vmatpush3.bf16.msra.mxu0 %v3027_v20  ;;  %v141_v20 = vcombine.high %v65_v17, %v65_v17 }
  0xa7   :  { %2780 = vmatprep.subr.bf16.mxu0 %v3029_v22  ;;  %2801 = vmatpush3.bf16.msra.mxu1 %v3028_v21  ;;  %v3079_v21 = vld [vmem:[#allocation5 + $0x540] sm:$0xff]   ;;  %v156_v22 = vcombine.high %v148_v19, %v148_v19 }
  0xa8   :  { %2802 = vmatprep.subr.bf16.mxu1 %v3030_v23  ;;  %v155_v23 = vrot.slane %v141_v20, %v3313_v35  ;;  %v3112_v20 = vld [vmem:[#allocation7] ss:$8 sps:$4 sm:$0xff]  }
  0xaa   :  { %2781 = vmatpush3.bf16.msra.mxu0 %v3031_v24  ;;  %v3080_v24 = vld [vmem:[#allocation5 + $0x5c0] sm:$0xff]  }
  0xab   :  { %2782 = vmatprep.subr.bf16.mxu0 %v3033_v26  ;;  %2803 = vmatpush3.bf16.msra.mxu1 %v3032_v25  ;;  %v215_v25 = vpack.c.bf16 %v148_v19, %v148_v19  ;;  %v3081_v26 = vld [vmem:[#allocation5 + $0x500] sm:$0xff]  }
  0xac   :  { %2804 = vmatprep.subr.bf16.mxu1 %v3034_v27  ;;  %v216_v27 = vpack.c.bf16 %v156_v22, %v156_v22  ;;  %v3117_v22 = vld [vmem:[#allocation7 + $0x14] ss:$8 sps:$4 sm:$0xff]  }
  0xae   :  { %2783 = vmatpush3.bf16.msra.mxu0 %v3035_v28  ;;  %v157_v28 = vcombine.high %v155_v23, %v155_v23 }
  0xaf   :  { %2784 = vmatprep.subr.bf16.mxu0 %v3037_v31  ;;  %2805 = vmatpush3.bf16.msra.mxu1 %v3036_v29  ;;  %v3082_v29 = vld [vmem:[#allocation5 + $0x580] sm:$0xff]   ;;  %v217_v31 = vpack.c.bf16 %v155_v23, %v155_v23  ;;  %v3115_v23 = vld [vmem:[#allocation7 + $0x10] ss:$8 sps:$4 sm:$0xff]  }
  0xb0   :  { %2806 = vmatprep.subr.bf16.mxu1 %v3038_v32  ;;  %v3083_v32 = vld [vmem:[#allocation5 + $0x548] sm:$0xff]  }
  0xb2   :  { %2785 = vmatpush3.bf16.msra.mxu0 %v3039_v33  ;;  %v218_v33 = vpack.c.bf16 %v157_v28, %v157_v28  ;;  %v3126_v28 = vld [vmem:[#allocation7 + $0x44] ss:$8 sps:$4 sm:$0xff]  }
  0xb3   :  { %2786 = vmatprep.subr.bf16.mxu0 %v3041_v36  ;;  %2807 = vmatpush3.bf16.msra.mxu1 %v3040_v34  ;;  %v3084_v34 = vld [vmem:[#allocation5 + $0x5c8] sm:$0xff]  }
  0xb4   :  { %2808 = vmatprep.subr.bf16.mxu1 %v3042_v37  ;;  %v3085_v36 = vld [vmem:[#allocation5 + $0x508] sm:$0xff]  }
  0xb5   :  { %v3086_v37 = vld [vmem:[#allocation5 + $0x588] sm:$0xff]  }
  0xb6   :  { %2787 = vmatpush3.bf16.msra.mxu0 %v3043_v38  ;;  %v3087_v38 = vld [vmem:[#allocation5 + $0x550] sm:$0xff]  }
  0xb7   :  { %2816 = vmatprep.subr.bf16.mxu0 %v3046_v42  ;;  %2809 = vmatpush3.bf16.msra.mxu1 %v3044_v43  ;;  %v3091_v42 = vld [vmem:[#allocation5 + $0x558] sm:$0xff]  }
  0xb8   :  { %2838 = vmatprep.subr.bf16.mxu1 %v3047_v46  ;;  %v3092_v43 = vld [vmem:[#allocation5 + $0x5d8] sm:$0xff]   ;;  %v3095_v46 = vld [vmem:[#allocation5 + $0x560] sm:$0xff]  }
  0xb9   :  { %2039 = vmatmul.mubr.bf16.vlgmr.msra.gmra.mrb[12].mxu0 %v211_v47  ;;  %v3096_v47 = vld [vmem:[#allocation5 + $0x5e0] sm:$0xff]  }
  0xba   :  { %2817 = vmatpush3.bf16.msra.mxu0 %v3048_v48  ;;  %2079 = vmatmul.mubr.bf16.vlgmr.msra.gmra.mrb[12].mxu1 %v213_v52  ;;  %v3097_v48 = vld [vmem:[#allocation5 + $0x520] sm:$0xff]   ;;  %v3101_v52 = vld [vmem:[#allocation5 + $0x528] sm:$0xff]  }
  0xbb   :  { %2818 = vmatprep.subr.bf16.mxu0 %v3050_v53  ;;  %2839 = vmatpush3.bf16.msra.mxu1 %v3049_v51  ;;  %v3100_v51 = vld [vmem:[#allocation5 + $0x5e8] sm:$0xff]  }
  0xbc   :  { %2840 = vmatprep.subr.bf16.mxu1 %v3051_v55  ;;  %2118 = vmatprep.mubr.bf16.mxu0 %v216_v27  ;;  %v3102_v53 = vld [vmem:[#allocation5 + $0x5a8] sm:$0xff]   ;;  %v3104_v55 = vld [vmem:[#allocation5 + $0x5f0] sm:$0xff]  }
  0xbd   :  { %2158 = vmatprep.mubr.bf16.mxu1 %v218_v33  ;;  %v3121_v27 = vld [vmem:[#allocation7 + $0x30] ss:$8 sps:$4 sm:$0xff]   ;;  %v3129_v33 = vld [vmem:[#allocation7 + $0x54] ss:$8 sps:$4 sm:$0xff]  }
  0xbe   :  { %2819 = vmatpush3.bf16.msra.mxu0 %v3052_v56  ;;  %v3105_v56 = vld [vmem:[#allocation5 + $0x530] sm:$0xff]  }
  0xbf   :  { %2820 = vmatprep.subr.bf16.mxu0 %v3054_v58  ;;  %2841 = vmatpush3.bf16.msra.mxu1 %v3053_v57  ;;  %v3106_v57 = vld [vmem:[#allocation5 + $0x5b0] sm:$0xff]   ;;  %v3107_v58 = vld [vmem:[#allocation5 + $0x578] sm:$0xff]  }
  0xc0   :  { %2842 = vmatprep.subr.bf16.mxu1 %v3055_v59  ;;  %v3108_v59 = vld [vmem:[#allocation5 + $0x5f8] sm:$0xff]  }
  0xc2   :  { %2821 = vmatpush3.bf16.msra.mxu0 %v3056_v60  ;;  %v3109_v60 = vld [vmem:[#allocation5 + $0x538] sm:$0xff]  }
  0xc3   :  { %2822 = vmatprep.subr.bf16.mxu0 %v3058_v62  ;;  %2843 = vmatpush3.bf16.msra.mxu1 %v3057_v61  ;;  %v66_v61 = vld [vmem:[#allocation2 + $0x28] sm:$0xff] }
  0xc4   :  { %2844 = vmatprep.subr.bf16.mxu1 %v3059_v63  ;;  %v3110_v62 = vld [vmem:[#allocation5 + $0x5b8] sm:$0xff]   ;;  %v165_v63 = vrot.slane %v66_v61, %v3313_v35 }
  0xc6   :  { %2823 = vmatpush3.bf16.msra.mxu0 %v3060_v0  ;;  %v158_v0 = vcombine.high %v66_v61, %v66_v61 }
  0xc7   :  { %2824 = vmatprep.subr.bf16.mxu0 %v3062_v2  ;;  %2845 = vmatpush3.bf16.msra.mxu1 %v3061_v1  ;;  %v173_v1 = vcombine.high %v165_v63, %v165_v63 }
  0xc8   :  { %2846 = vmatprep.subr.bf16.mxu1 %v3063_v3  ;;  %v172_v2 = vrot.slane %v158_v0, %v3313_v35  ;;  %v219_v3 = vpack.c.bf16 %v165_v63, %v165_v63 }
  0xca   :  { %2825 = vmatpush3.bf16.msra.mxu0 %v3064_v4  ;;  %v220_v4 = vpack.c.bf16 %v173_v1, %v173_v1 }
  0xcb   :  { %2826 = vmatprep.subr.bf16.mxu0 %v3066_v6  ;;  %2847 = vmatpush3.bf16.msra.mxu1 %v3065_v5  ;;  %v174_v5 = vcombine.high %v172_v2, %v172_v2  ;;  %v221_v6 = vpack.c.bf16 %v172_v2, %v172_v2 }
  0xcc   :  { %2848 = vmatprep.subr.bf16.mxu1 %v3067_v7 }
  0xcd   :  { %v222_v7 = vpack.c.bf16 %v174_v5, %v174_v5 }
  0xce   :  { %2827 = vmatpush3.bf16.msra.mxu0 %v3068_v8 }
  0xcf   :  { %2828 = vmatprep.subr.bf16.mxu0 %v3070_v10  ;;  %2849 = vmatpush3.bf16.msra.mxu1 %v3069_v9  ;;  %v2431_v9 = vld [vmem:[%s3349_s2] ss:$0 sm:$0xff] }
  0xd0   :  { %2850 = vmatprep.subr.bf16.mxu1 %v3071_v11 }
  0xd2   :  { %2829 = vmatpush3.bf16.msra.mxu0 %v3072_v12 }
  0xd3   :  { %2830 = vmatprep.subr.bf16.mxu0 %v3074_v14  ;;  %2851 = vmatpush3.bf16.msra.mxu1 %v3073_v13 }
  0xd4   :  { %2852 = vmatprep.subr.bf16.mxu1 %v3075_v15 }
  0xd6   :  { %2831 = vmatpush3.bf16.msra.mxu0 %v3076_v16 }
  0xd7   :  { %2860 = vmatprep.subr.bf16.mxu0 %v3079_v21  ;;  %2853 = vmatpush3.bf16.msra.mxu1 %v3077_v18  ;;  %v3114_v21 = vld [vmem:[#allocation7 + $0x4] ss:$8 sps:$4 sm:$0xff]  }
  0xd8   :  { %2882 = vmatprep.subr.bf16.mxu1 %v3080_v24  ;;  %v3120_v24 = vld [vmem:[#allocation7 + $0x24] ss:$8 sps:$4 sm:$0xff]  }
  0xd9   :  { %2119 = vmatmul.mubr.bf16.vlgmr.msra.gmra.mrb[16].mxu0 %v215_v25  ;;  %v3118_v25 = vld [vmem:[#allocation7 + $0x20] ss:$8 sps:$4 sm:$0xff]  }
  0xda   :  { %2861 = vmatpush3.bf16.msra.mxu0 %v3081_v26  ;;  %2159 = vmatmul.mubr.bf16.vlgmr.msra.gmra.mrb[16].mxu1 %v217_v31  ;;  %v3123_v26 = vld [vmem:[#allocation7 + $0x34] ss:$8 sps:$4 sm:$0xff]  }
  0xdb   :  { %2862 = vmatprep.subr.bf16.mxu0 %v3083_v32  ;;  %2883 = vmatpush3.bf16.msra.mxu1 %v3082_v29  ;;  %v3124_v29 = vld [vmem:[#allocation7 + $0x40] ss:$8 sps:$4 sm:$0xff]  }
  0xdc   :  { %2884 = vmatprep.subr.bf16.mxu1 %v3084_v34  ;;  %2198 = vmatprep.mubr.bf16.mxu0 %v220_v4 }
  0xdd   :  { %2238 = vmatprep.mubr.bf16.mxu1 %v222_v7 }
  0xde   :  { %2863 = vmatpush3.bf16.msra.mxu0 %v3085_v36 }
  0xdf   :  { %2864 = vmatprep.subr.bf16.mxu0 %v3087_v38  ;;  %2885 = vmatpush3.bf16.msra.mxu1 %v3086_v37  ;;  %v3127_v38 = vld [vmem:[#allocation7 + $0x50] ss:$8 sps:$4 sm:$0xff]  }
  0xe0   :  { %2886 = vmatprep.subr.bf16.mxu1 %v3088_v39 }
  0xe2   :  { %2865 = vmatpush3.bf16.msra.mxu0 %v3089_v40 }
  0xe3   :  { %2866 = vmatprep.subr.bf16.mxu0 %v3091_v42  ;;  %2887 = vmatpush3.bf16.msra.mxu1 %v3090_v41 }
  0xe4   :  { %2888 = vmatprep.subr.bf16.mxu1 %v3092_v43 }
  0xe6   :  { %2867 = vmatpush3.bf16.msra.mxu0 %v3093_v44 }
  0xe7   :  { %2868 = vmatprep.subr.bf16.mxu0 %v3095_v46  ;;  %2889 = vmatpush3.bf16.msra.mxu1 %v3094_v45  ;;  %v3132_v45 = vld [vmem:[#allocation7 + $0x64] ss:$8 sps:$4 sm:$0xff]  }
  0xe8   :  { %2890 = vmatprep.subr.bf16.mxu1 %v3096_v47  ;;  %v3130_v47 = vld [vmem:[#allocation7 + $0x60] ss:$8 sps:$4 sm:$0xff]  }
  0xea   :  { %2869 = vmatpush3.bf16.msra.mxu0 %v3097_v48  ;;  %v3135_v48 = vld [vmem:[#allocation7 + $0x74] ss:$8 sps:$4 sm:$0xff]  }
  0xeb   :  { %2870 = vmatprep.subr.bf16.mxu0 %v3099_v50  ;;  %2891 = vmatpush3.bf16.msra.mxu1 %v3098_v49  ;;  %v3133_v49 = vld [vmem:[#allocation7 + $0x70] ss:$8 sps:$4 sm:$0xff]   ;;  %v3242_v50 = vmov 0  }
  0xec   :  { %2892 = vmatprep.subr.bf16.mxu1 %v3100_v51 }
  0xee   :  { %2871 = vmatpush3.bf16.msra.mxu0 %v3101_v52 }
  0xef   :  { %2872 = vmatprep.subr.bf16.mxu0 %v3103_v54  ;;  %2893 = vmatpush3.bf16.msra.mxu1 %v3102_v53 }
  0xf0   :  { %2894 = vmatprep.subr.bf16.mxu1 %v3104_v55 }
  0xf2   :  { %2873 = vmatpush3.bf16.msra.mxu0 %v3105_v56 }
  0xf3   :  { %2874 = vmatprep.subr.bf16.mxu0 %v3107_v58  ;;  %2895 = vmatpush3.bf16.msra.mxu1 %v3106_v57 }
  0xf4   :  { %2896 = vmatprep.subr.bf16.mxu1 %v3108_v59 }
  0xf6   :  { %2875 = vmatpush3.bf16.msra.mxu0 %v3109_v60 }
  0xf7   :  { %2897 = vmatpush3.bf16.msra.mxu1 %v3110_v62  ;;  %2356 = vmatprep.subr.bf16.mxu0 %v3114_v21 }
  0xf9   :  { %2199 = vmatmul.mubr.bf16.vlgmr.msra.gmra.mrb[20].mxu0 %v219_v3 }
  0xfa   :  { %2239 = vmatmul.mubr.bf16.vlgmr.msra.gmra.mrb[20].mxu1 %v221_v6  ;;  %2357 = vmatpush1.bf16.msra.mxu0 %v3112_v20 }
  0xfb   :  { %2358 = vmatprep.subr.bf16.mxu0 %v3117_v22  ;;  %2388 = vmatprep.mubr.bf16.mxu0 %v3242_v50 }
  0xfe   :  { %2359 = vmatpush1.bf16.msra.mxu0 %v3115_v23 }
  0xff   :  { %2360 = vmatprep.subr.bf16.mxu0 %v3120_v24 }
 0x102   :  { %2361 = vmatpush1.bf16.msra.mxu0 %v3118_v25 }
 0x103   :  { %2362 = vmatprep.subr.bf16.mxu0 %v3123_v26 }
 0x106   :  { %2363 = vmatpush1.bf16.msra.mxu0 %v3121_v27 }
 0x107   :  { %2364 = vmatprep.subr.bf16.mxu0 %v3126_v28 }
 0x10a   :  { %2365 = vmatpush1.bf16.msra.mxu0 %v3124_v29 }
 0x10b   :  { %2366 = vmatprep.subr.bf16.mxu0 %v3129_v33 }
 0x10e   :  { %2367 = vmatpush1.bf16.msra.mxu0 %v3127_v38  ;;  %v2268_v38 = vsub.s32 0, %v3310_v30 }
 0x10f   :  { %2368 = vmatprep.subr.bf16.mxu0 %v3132_v45 }
 0x112   :  { %2369 = vmatpush1.bf16.msra.mxu0 %v3130_v47 }
 0x113   :  { %2370 = vmatprep.subr.bf16.mxu0 %v3135_v48 }
 0x116   :  { %2371 = vmatpush1.bf16.msra.mxu0 %v3133_v49 }
 0x12c   :  { %v2656_v8 = vpop.f32.mrb[0].mxu0 }
 0x12d   :  { %v2657_v10 = vpop.f32.mrb[1].mxu0  ;;  %v2678_v11 = vpop.f32.mrb[0].mxu1 }
 0x12e   :  { %v2658_v35 = vadd.f32 %v2657_v10, %v2656_v8  ;;  %v2659_v12 = vpop.f32.mrb[2].mxu0  ;;  %v2679_v13 = vpop.f32.mrb[1].mxu1 }
 0x12f   :  { %v2660_v14 = vpop.f32.mrb[3].mxu0  ;;  %v2680_v16 = vadd.f32 %v2679_v13, %v2678_v11  ;;  %v2681_v17 = vpop.f32.mrb[2].mxu1 }
 0x130   :  { %v1801_v15 = vadd.f32 %v2658_v35, %v2431_v9  ;;  %v2682_v18 = vpop.f32.mrb[3].mxu1 }
 0x132   :  { %v1841_v19 = vadd.f32 %v2680_v16, %v1801_v15 }
 0x14c   :  { %v2700_v31 = vpop.f32.mrb[4].mxu0 }
 0x14d   :  { %v2701_v32 = vpop.f32.mrb[5].mxu0  ;;  %v2722_v34 = vpop.f32.mrb[4].mxu1 }
 0x14e   :  { %v2702_v36 = vadd.f32 %v2701_v32, %v2700_v31  ;;  %v2703_v37 = vpop.f32.mrb[6].mxu0  ;;  %v2723_v39 = vpop.f32.mrb[5].mxu1 }
 0x14f   :  { %v2704_v40 = vpop.f32.mrb[7].mxu0  ;;  %v2724_v42 = vadd.f32 %v2723_v39, %v2722_v34  ;;  %v2725_v43 = vpop.f32.mrb[6].mxu1  ;;  %v2264_v39 = vld [vmem:[%s3351_s4] sm:$0x3]  ;;  %s3243_s4 = smov [#allocation8]  }
 0x150   :  { %v1881_v41 = vadd.f32 %v2702_v36, %v1841_v19  ;;  %v2726_v44 = vpop.f32.mrb[7].mxu1  ;;  %v2272_v40 = vsub.s32 1, %v3310_v30  ;;  %s2421_s8 = sshll.u32 %s3243_s4, 4  ;;  %s2422_s8 = int_to_ptr.vmem [resolvable:$true] %s2421_s8 }
 0x151   :  { %s3206_s9 = scalar_lea.vmem %s2422_s8, 32  ;;  %p3211_p11 = scmp.lt.s32.totalorder %s2422_s8, %s2422_s8 }
 0x152   :  { %v1921_v46 = vadd.f32 %v2724_v42, %v1881_v41  ;;  %v2269_v41 = vrot.slane %v2264_v39, %v2268_v38  ;;  %v2273_v42 = vrot.slane %v2264_v39, %v2272_v40  ;;  %p3207_p10 = scmp.ne.s32.totalorder %s2422_s8, %s3206_s9  ;;  %p3212_p12 = scmp.lt.s32.totalorder %s3206_s9, %s3206_s9 }
 0x154   :  { %p3213_p13 = por %p3212_p12, %p3211_p11 }
 0x156   :  { %p3214_p0 = pnand %p3213_p13, %p3207_p10 }
 0x16c   :  { %v2744_v51 = vpop.f32.mrb[8].mxu0 }
 0x16d   :  { %v2745_v52 = vpop.f32.mrb[9].mxu0  ;;  %v2766_v53 = vpop.f32.mrb[8].mxu1 }
 0x16e   :  { %v2746_v54 = vadd.f32 %v2745_v52, %v2744_v51  ;;  %v2747_v55 = vpop.f32.mrb[10].mxu0  ;;  %v2767_v56 = vpop.f32.mrb[9].mxu1 }
 0x16f   :  { %v2748_v57 = vpop.f32.mrb[11].mxu0  ;;  %v2768_v59 = vadd.f32 %v2767_v56, %v2766_v53  ;;  %v2769_v60 = vpop.f32.mrb[10].mxu1 }
 0x170   :  { %v1961_v58 = vadd.f32 %v2746_v54, %v1921_v46  ;;  %v2770_v61 = vpop.f32.mrb[11].mxu1 }
 0x172   :  { %v2001_v62 = vadd.f32 %v2768_v59, %v1961_v58 }
 0x18c   :  { %v2788_v63 = vpop.f32.mrb[12].mxu0 }
 0x18d   :  { %v2789_v0 = vpop.f32.mrb[13].mxu0  ;;  %v2810_v1 = vpop.f32.mrb[12].mxu1 }
 0x18e   :  { %v2790_v2 = vadd.f32 %v2789_v0, %v2788_v63  ;;  %v2791_v3 = vpop.f32.mrb[14].mxu0  ;;  %v2811_v4 = vpop.f32.mrb[13].mxu1 }
 0x18f   :  { %v2792_v5 = vpop.f32.mrb[15].mxu0  ;;  %v2812_v7 = vadd.f32 %v2811_v4, %v2810_v1  ;;  %v2813_v8 = vpop.f32.mrb[14].mxu1 }
 0x190   :  { %v2041_v6 = vadd.f32 %v2790_v2, %v2001_v62  ;;  %v2814_v9 = vpop.f32.mrb[15].mxu1 }
 0x192   :  { %v2081_v10 = vadd.f32 %v2812_v7, %v2041_v6 }
 0x1ac   :  { %v2832_v11 = vpop.f32.mrb[16].mxu0 }
 0x1ad   :  { %v2833_v35 = vpop.f32.mrb[17].mxu0  ;;  %v2854_v12 = vpop.f32.mrb[16].mxu1 }
 0x1ae   :  { %v2834_v13 = vadd.f32 %v2833_v35, %v2832_v11  ;;  %v2835_v14 = vpop.f32.mrb[18].mxu0  ;;  %v2855_v15 = vpop.f32.mrb[17].mxu1 }
 0x1af   :  { %v2836_v16 = vpop.f32.mrb[19].mxu0  ;;  %v2856_v18 = vadd.f32 %v2855_v15, %v2854_v12  ;;  %v2857_v19 = vpop.f32.mrb[18].mxu1 }
 0x1b0   :  { %v2121_v17 = vadd.f32 %v2834_v13, %v2081_v10  ;;  %v2858_v20 = vpop.f32.mrb[19].mxu1 }
 0x1b2   :  { %v2161_v21 = vadd.f32 %v2856_v18, %v2121_v17 }
 0x1cc   :  { %v2876_v22 = vpop.f32.mrb[20].mxu0 }
 0x1cd   :  { %v2877_v23 = vpop.f32.mrb[21].mxu0  ;;  %v2898_v24 = vpop.f32.mrb[20].mxu1 }
 0x1ce   :  { %v2878_v25 = vadd.f32 %v2877_v23, %v2876_v22  ;;  %v2879_v26 = vpop.f32.mrb[22].mxu0  ;;  %v2899_v27 = vpop.f32.mrb[21].mxu1 }
 0x1cf   :  { %v2880_v28 = vpop.f32.mrb[23].mxu0  ;;  %v2900_v31 = vadd.f32 %v2899_v27, %v2898_v24  ;;  %v2901_v32 = vpop.f32.mrb[22].mxu1 }
 0x1d0   :  { %v2201_v29 = vadd.f32 %v2878_v25, %v2161_v21  ;;  %v2902_v33 = vpop.f32.mrb[23].mxu1 }
 0x1d2   :  { %v2241_v34 = vadd.f32 %v2900_v31, %v2201_v29 }
 0x1d4   :  { %v2246_v36 = vmax.f32 %v2241_v34, 0.0 }
 0x1d6   :  { %v2247_v37 = vpack.c.bf16 %v2246_v36, %v2246_v36 }
 0x1d8   :  { %2389 = vmatmul.mubr.bf16.vlgmr.msra.gmra.mrb[24].mxu0 %v2247_v37 }
 0x2ab   :  { %v2390_v43 = vpop.f32.mrb[24].mxu0 }
 0x2ac   :  { %v2391_v44 = vadd.f32 %v2390_v43, %v2269_v41  ;;  %v2392_v45 = vpop.f32.mrb[25].mxu0 }
 0x2ad   :  { %v2393_v46 = vadd.f32 %v2392_v45, %v2273_v42  ;;  %v2394_v47 = vpop.f32.mrb[26].mxu0 }
 0x2ae   :  { %v2395_v48 = vpop.f32.mrb[27].mxu0 }
 0x2af   :  { %v2397_v49 = vmul.f32 %v2393_v46, %v2391_v44 }
 0x2b1   :  { %vm2398_vm0 = vcmp.gt.f32.partialorder %v2397_v49, 0.0 }
 0x2b2   :  { %v2399_v50 = vsel %vm2398_vm0, %v2393_v46, 0.0 }
 0x2b3   :  { %v2400_v51 = vadd.f32 %v2399_v50, %v2391_v44 }
 0x2b5   :  { %v2402_v52 = vsel %vm2401_vm1, %v2400_v51, -inf }
 0x2b6   :  { %2403 = vmax.xlane.f32.xlu0 %v2402_v52 }
 0x343   :  { %v2404_v53 = vpop.xlane.xlu0 %2403 }
 0x344   :  { %v2405_v54 = vsub.f32 %v2400_v51, %v2404_v53 }
 0x346   :  { %v2406_v55 = vmul.f32 1.442695, %v2405_v54 }
 0x348   :  { %3136 = vpow2.f32 %v2406_v55 }
 0x352   :  { %v3137_v30 = vpop.eup %3136 }
 0x353   :  { %v2408_v56 = vsel %vm2401_vm1, %v3137_v30, 0.0 }
 0x354   :  { %2409 = vadd.xlane.f32.xlu0 %v2408_v56 }
 0x3e1   :  { %v2410_v57 = vpop.xlane.xlu0 %2409 }
 0x3e2   :  { %3138 = vlog2.f32 %v2410_v57 }
 0x3ec   :  { %v3139_v58 = vpop.eup %3138 }
 0x3ed   :  { %v2412_v59 = vmul.f32 0.6931472, %v3139_v58 }
 0x3ef   :  { %v2413_v60 = vsub.f32 %v2405_v54, %v2412_v59 }
 0x3f1   :  { %2414 = vst [vmem:[#allocation8] sm:$0x3] %v2413_v60 }
 0x3f2   :  { %3217 = shalt.err (!%p3214_p0)
}
 0x3f3   :  { %s3218_s12 = scalar_lea.hbm %s3352_s5, 32 }
 0x3f4   :  { %p3219_p1 = scmp.ne.s32.totalorder %s3352_s5, %s3218_s12  ;;  %p3222_p2 = scmp.lt.u32.totalorder %s3218_s12, %s3352_s5 }
 0x3f6   :  { %p3224_p3 = pnand %p3222_p2, %p3219_p1 }
 0x3f8   :  { %3227 = shalt.err (!%p3224_p3)
}
 0x3f9   :  { %2424 = dma.vmem_to_hbm [thread:$0]  %s2422_s8, 32, %s3352_s5, [#allocation4]  }
 0x3fa   :  { %3232 = dma.done.wait [#allocation4], 32  }
 0x3fb   :  { %3233 = vsyncadd [#allocation4], 4294967264 }
 0x3fc   :  { %2428 = vsyncpa [#allocation3], 1 }
 0x3fd   :  { %2429 = vsyncpa [#allocation6], 1 }
 0x3fe   :  { %2430 = vsyncpa [#allocation4], 1 }

</bundles_post_ra>
